<compile_context>
chip_gen: v7x
topology: tpu7x:2x2x1
jax: 0.10.0
libtpu: 0.0.40
codegen_flags: <defaults>
</compile_context>

<pallas_src>
import functools

import jax
import jax.numpy as jnp
from jax import lax
from jax.experimental import pallas as pl
from jax.experimental.pallas import tpu as pltpu


def _fused_ln_head_kernel(tok_ref, pos_ref, scale_ref, shift_ref, w_ref, o_ref, *, eps):
    """(token_emb + pos_emb) -> LayerNorm -> out_head matmul, all resident in VMEM.

    Block shapes:
      tok_ref:   (1, ts, D)   token embeddings for this (batch, seq-tile)
      pos_ref:   (ts, D)      positional embeddings for this seq-tile
      scale_ref: (1, D)       LayerNorm scale
      shift_ref: (1, D)       LayerNorm shift
      w_ref:     (D, tv)      out_head weight tile (lane-dense vocab tile)
      o_ref:     (1, ts, tv)  logits tile
    """
    h = tok_ref[0].astype(jnp.float32) + pos_ref[...].astype(jnp.float32)       # (ts, D)
    # TODO(synk): nn.Dropout is inference-mode identity here (no stochastic mask).
    # TODO(synk): Optimus transformer blocks: identity pass-through (spec not provided).
    mean = jnp.mean(h, axis=-1, keepdims=True)
    centered = h - mean
    var = jnp.mean(centered * centered, axis=-1, keepdims=True)                 # biased variance
    normed = centered * lax.rsqrt(var + eps)
    normed = normed * scale_ref[...].astype(jnp.float32) \
                    + shift_ref[...].astype(jnp.float32)
    logits = jnp.dot(normed.astype(w_ref.dtype), w_ref[...],
                     preferred_element_type=jnp.float32)                        # MXU, (ts, tv)
    o_ref[0] = logits.astype(o_ref.dtype)


def _pick_tile(n: int, target: int, align: int) -> int:
    """Tile size <= target (multiple of `align`), preferring exact divisors of n.

    Never degrades below target // 2 (avoids the pathological tiny-tile fallback);
    a partial trailing block is handled correctly by the pl.cdiv grid + masked stores.
    """
    if n <= target:
        return n
    best = (target // align) * align
    t = best
    while t >= max(align, target // 2):
        if n % t == 0:
            return t
        t -= align
    return best


def polymnia_forward(token_ids: jax.Array, params: dict, *, eps: float = 1e-5) -> jax.Array:
    """Full Polymnia forward pass; returns logits of shape (B, S, vocab_size)."""
    tok_table = params["token_embedding"]          # (vocab_size, D)
    pos_table = params["pos_embedding"]            # (context_length, D)
    scale = params["ln_scale"].reshape(1, -1)      # (1, D)
    shift = params["ln_shift"].reshape(1, -1)      # (1, D)
    w_out = params["w_out"]                        # (D, vocab_size) == out_head.weight.T

    B, S = token_ids.shape
    D = tok_table.shape[1]
    V = w_out.shape[1]

    # Embedding lookups: data-dependent gathers handled by XLA; everything after is fused.
    tok_emb = jnp.take(tok_table, token_ids, axis=0)    # (B, S, D)
    pos_emb = pos_table[:S]                              # (S, D)

    ts = _pick_tile(S, 256, 8)      # row tile (sublane axis)
    tv = _pick_tile(V, 512, 128)    # lane-dense vocab tile (multiple of 128)

    grid = (B, pl.cdiv(S, ts), pl.cdiv(V, tv))

    kernel = functools.partial(_fused_ln_head_kernel, eps=eps)
    logits = pl.pallas_call(
        kernel,
        out_shape=jax.ShapeDtypeStruct((B, S, V), jnp.float32),
        grid_spec=pltpu.PrefetchScalarGridSpec(
            num_scalar_prefetch=0,
            grid=grid,
            in_specs=[
                pl.BlockSpec((1, ts, D), lambda b, s, v: (b, s, 0)),   # token embeddings
                pl.BlockSpec((ts, D),    lambda b, s, v: (s, 0)),      # positional embeddings
                pl.BlockSpec((1, D),     lambda b, s, v: (0, 0)),      # LN scale
                pl.BlockSpec((1, D),     lambda b, s, v: (0, 0)),      # LN shift
                pl.BlockSpec((D, tv),    lambda b, s, v: (0, v)),      # out_head weight tile
            ],
            out_specs=pl.BlockSpec((1, ts, tv), lambda b, s, v: (b, s, v)),
        ),
        compiler_params=pltpu.CompilerParams(
            dimension_semantics=("parallel", "parallel", "parallel"),
        ),
    )(tok_emb, pos_emb, scale, shift, w_out)
    return logits


def polymnia_reference(token_ids: jax.Array, params: dict, eps: float = 1e-5) -> jax.Array:
    """Pure-JAX reference of the same forward pass (for validation)."""
    tok = params["token_embedding"][token_ids]
    pos = params["pos_embedding"][: token_ids.shape[1]]
    h = tok + pos                                   # dropout (eval) + Optimus blocks = identity
    mean = h.mean(-1, keepdims=True)
    var = ((h - mean) ** 2).mean(-1, keepdims=True)
    normed = (h - mean) / jnp.sqrt(var + eps)
    normed = normed * params["ln_scale"] + params["ln_shift"]
    return jnp.dot(normed, params["w_out"], precision=jax.lax.Precision.HIGHEST)


if __name__ == "__main__":
    config = dict(vocab_size=256, emb_dim=128, context_length=16,
                  drop_rate=0.1, n_layers=2)

    key = jax.random.PRNGKey(0)
    k_tok, k_pos, k_scale, k_shift, k_w, k_x = jax.random.split(key, 6)

    params = {
        "token_embedding": 0.02 * jax.random.normal(
            k_tok, (config["vocab_size"], config["emb_dim"]), jnp.float32),
        "pos_embedding": 0.02 * jax.random.normal(
            k_pos, (config["context_length"], config["emb_dim"]), jnp.float32),
        "ln_scale": 1.0 + 0.1 * jax.random.normal(k_scale, (config["emb_dim"],), jnp.float32),
        "ln_shift": 0.1 * jax.random.normal(k_shift, (config["emb_dim"],), jnp.float32),
        "w_out": 0.02 * jax.random.normal(
            k_w, (config["emb_dim"], config["vocab_size"]), jnp.float32),
    }

    # Token ids: (batch=2, seq=8) in [0, vocab_size)
    x = jax.random.randint(k_x, (2, 8), 0, config["vocab_size"], dtype=jnp.int32)

    y = jax.block_until_ready(polymnia_forward(x, params))
    ref = jax.block_until_ready(polymnia_reference(x, params))

    assert y.shape == (2, 8, config["vocab_size"]) and y.dtype == jnp.float32
    # Loose-ish tolerance: covers MXU f32 multi-pass vs HIGHEST-precision XLA matmul.
    assert bool(jnp.allclose(y, ref, rtol=1e-2, atol=1e-2)), \
        float(jnp.max(jnp.abs(y - ref)))

    print("KERNEL_OK")
</pallas_src>

<mosaic_0001>
module attributes {stable_mosaic.version = 11 : i64} {
  func.func @_fused_ln_head_kernel(%arg0: i32, %arg1: i32, %arg2: i32, %arg3: memref<1x8x128xf32, #tpu.memory_space<vmem>>, %arg4: memref<8x128xf32, #tpu.memory_space<vmem>>, %arg5: memref<1x128xf32, #tpu.memory_space<vmem>>, %arg6: memref<1x128xf32, #tpu.memory_space<vmem>>, %arg7: memref<128x256xf32, #tpu.memory_space<vmem>>, %arg8: memref<1x8x256xf32, #tpu.memory_space<vmem>>) attributes {dimension_semantics = [#tpu.dimension_semantics<parallel>, #tpu.dimension_semantics<parallel>, #tpu.dimension_semantics<parallel>], iteration_bounds = array<i64: 2, 1, 1>, scalar_prefetch = 0 : i64, scratch_operands = 0 : i64, tpu.core_type = #tpu.core_type<tc>, window_params = [{transform_indices = @transform_0, window_bounds = array<i64: 1, 8, 128>}, {transform_indices = @transform_1, window_bounds = array<i64: 8, 128>}, {pipeline_mode = #tpu.pipeline_mode<synchronous>, transform_indices = @transform_2, window_bounds = array<i64: 1, 128>}, {pipeline_mode = #tpu.pipeline_mode<synchronous>, transform_indices = @transform_3, window_bounds = array<i64: 1, 128>}, {transform_indices = @transform_4, window_bounds = array<i64: 128, 256>}, {transform_indices = @transform_5, window_bounds = array<i64: 1, 8, 256>}]} {
    %c0 = arith.constant 0 : index
    %c0_0 = arith.constant 0 : index
    %c0_1 = arith.constant 0 : index
    %0 = vector.load %arg3[%c0, %c0_0, %c0_1] : memref<1x8x128xf32, #tpu.memory_space<vmem>>, vector<1x8x128xf32>
    %1 = vector.shape_cast %0 : vector<1x8x128xf32> to vector<8x128xf32>
    %c0_2 = arith.constant 0 : index
    %c0_3 = arith.constant 0 : index
    %2 = vector.load %arg4[%c0_2, %c0_3] : memref<8x128xf32, #tpu.memory_space<vmem>>, vector<8x128xf32>
    %3 = arith.addf %1, %2 : vector<8x128xf32>
    %cst = arith.constant dense<0.000000e+00> : vector<8xf32>
    %4 = vector.multi_reduction <add>, %3, %cst [1] : vector<8x128xf32> to vector<8xf32>
    %5 = vector.shape_cast %4 : vector<8xf32> to vector<8x1xf32>
    %cst_4 = arith.constant 1.280000e+02 : f32
    %6 = vector.broadcast %cst_4 : f32 to vector<8x1xf32>
    %7 = arith.divf %5, %6 : vector<8x1xf32>
    %8 = vector.broadcast %7 : vector<8x1xf32> to vector<8x128xf32>
    %9 = arith.subf %3, %8 : vector<8x128xf32>
    %10 = arith.mulf %9, %9 : vector<8x128xf32>
    %cst_5 = arith.constant dense<0.000000e+00> : vector<8xf32>
    %11 = vector.multi_reduction <add>, %10, %cst_5 [1] : vector<8x128xf32> to vector<8xf32>
    %12 = vector.shape_cast %11 : vector<8xf32> to vector<8x1xf32>
    %cst_6 = arith.constant 1.280000e+02 : f32
    %13 = vector.broadcast %cst_6 : f32 to vector<8x1xf32>
    %14 = arith.divf %12, %13 : vector<8x1xf32>
    %cst_7 = arith.constant 9.99999974E-6 : f32
    %15 = vector.broadcast %cst_7 : f32 to vector<8x1xf32>
    %16 = arith.addf %14, %15 : vector<8x1xf32>
    %17 = math.rsqrt %16 : vector<8x1xf32>
    %18 = vector.broadcast %17 : vector<8x1xf32> to vector<8x128xf32>
    %19 = arith.mulf %9, %18 : vector<8x128xf32>
    %c0_8 = arith.constant 0 : index
    %c0_9 = arith.constant 0 : index
    %20 = vector.load %arg5[%c0_8, %c0_9] : memref<1x128xf32, #tpu.memory_space<vmem>>, vector<1x128xf32>
    %21 = vector.broadcast %20 : vector<1x128xf32> to vector<8x128xf32>
    %22 = arith.mulf %19, %21 : vector<8x128xf32>
    %c0_10 = arith.constant 0 : index
    %c0_11 = arith.constant 0 : index
    %23 = vector.load %arg6[%c0_10, %c0_11] : memref<1x128xf32, #tpu.memory_space<vmem>>, vector<1x128xf32>
    %24 = vector.broadcast %23 : vector<1x128xf32> to vector<8x128xf32>
    %25 = arith.addf %22, %24 : vector<8x128xf32>
    %c0_12 = arith.constant 0 : index
    %c0_13 = arith.constant 0 : index
    %26 = vector.load %arg7[%c0_12, %c0_13] : memref<128x256xf32, #tpu.memory_space<vmem>>, vector<128x256xf32>
    %cst_14 = arith.constant dense<0.000000e+00> : vector<8x256xf32>
    %27 = tpu.matmul %25, %26, %cst_14 {dimension_numbers = #tpu.dot_dimension_numbers<[1], [0], [0], [1], [0, 0, 1, 1], [], []>} : vector<8x128xf32>, vector<128x256xf32>, vector<8x256xf32> -> vector<8x256xf32>
    %c0_15 = arith.constant 0 : index
    %c0_16 = arith.constant 0 : index
    %c0_17 = arith.constant 0 : index
    %28 = vector.load %arg8[%c0_15, %c0_16, %c0_17] : memref<1x8x256xf32, #tpu.memory_space<vmem>>, vector<1x8x256xf32>
    %29 = vector.shape_cast %28 : vector<1x8x256xf32> to vector<8x256xf32>
    %30 = vector.shape_cast %27 : vector<8x256xf32> to vector<1x8x256xf32>
    tpu.vector_store %arg8[%c0_15, %c0_16, %c0_17], %30 {strides = array<i32>} : memref<1x8x256xf32, #tpu.memory_space<vmem>>, vector<1x8x256xf32>,
    return
  }
  func.func @transform_0(%arg0: i32, %arg1: i32, %arg2: i32) -> (i32, i32, i32) {
    %c0_i32 = arith.constant 0 : i32
    %c0_i32_0 = arith.constant 0 : i32
    return %arg0, %arg1, %c0_i32 : i32, i32, i32
  }
  func.func @transform_1(%arg0: i32, %arg1: i32, %arg2: i32) -> (i32, i32) {
    %c0_i32 = arith.constant 0 : i32
    %c0_i32_0 = arith.constant 0 : i32
    return %arg1, %c0_i32 : i32, i32
  }
  func.func @transform_2(%arg0: i32, %arg1: i32, %arg2: i32) -> (i32, i32) {
    %c0_i32 = arith.constant 0 : i32
    %c0_i32_0 = arith.constant 0 : i32
    %c0_i32_1 = arith.constant 0 : i32
    return %c0_i32, %c0_i32_0 : i32, i32
  }
  func.func @transform_3(%arg0: i32, %arg1: i32, %arg2: i32) -> (i32, i32) {
    %c0_i32 = arith.constant 0 : i32
    %c0_i32_0 = arith.constant 0 : i32
    %c0_i32_1 = arith.constant 0 : i32
    return %c0_i32, %c0_i32_0 : i32, i32
  }
  func.func @transform_4(%arg0: i32, %arg1: i32, %arg2: i32) -> (i32, i32) {
    %c0_i32 = arith.constant 0 : i32
    %c0_i32_0 = arith.constant 0 : i32
    return %c0_i32, %arg2 : i32, i32
  }
  func.func @transform_5(%arg0: i32, %arg1: i32, %arg2: i32) -> (i32, i32, i32) {
    %c0_i32 = arith.constant 0 : i32
    return %arg0, %arg1, %arg2 : i32, i32, i32
  }
}

</mosaic_0001>

<bundles_post_ra>
// kernel: tpu_custom_call.1
= control target key start
LH: loop header
LB: loop body
LE: loop exit
PB: predicated region body
PF: predicated region fallthrough
CT: control target
= control target key end

     0   :  { %10 = vsyncpa [#allocation3], 0  ;;  %s1177_s0 = inlined_call_operand.hbm [shape: f32[2,8,128], index: 0, kind: input, shape index: {}]   ;;  %s1178_s1 = inlined_call_operand.hbm [shape: f32[8,128], index: 1, kind: input, shape index: {}]   ;;  %s1179_s2 = inlined_call_operand.vmem [shape: f32[1,128], index: 2, kind: input, shape index: {}]   ;;  %s1180_s3 = inlined_call_operand.vmem [shape: f32[1,128], index: 3, kind: input, shape index: {}]   ;;  %s1181_s4 = inlined_call_operand.hbm [shape: f32[128,256], index: 4, kind: input, shape index: {}]   ;;  %s1182_s5 = inlined_call_operand.hbm [shape: f32[2,8,256], index: 5, kind: output, shape index: {}]  }
   0x1   :  { %12 = vsyncpa [#allocation3 + $0x1], 0 }
   0x2   :  { %13 = vsyncpa [#allocation6], 0 }
   0x3   :  { %14 = vsyncpa [#allocation4], 0 }
   0x4   :  { %16 = vsyncpa [#allocation4 + $0x1], 0  ;;  %s927_s18 = smov 0   ;;  %s929_s19 = smov 0  }
   0x5   :  { %s931_s20 = smov 0   ;;  %s933_s21 = smov 0  }
   0x6   :  { %s935_s22 = smov 0   ;;  %s937_s23 = smov 0  }
   0x7 LB: > { %s575_s24 = sadd.s32 4294967295, %s888_s23   ;;  %s576_s25 = sadd.s32 4294967294, %s888_s23   ;;  %s888_s23 = sphi %s937_s23, %s22_s23   ;;  %s884_s22 = sphi %s935_s22, %s1205_s22   ;;  %s880_s21 = sphi %s933_s21, %s1204_s21   ;;  %s876_s20 = sphi %s931_s20, %s1203_s20   ;;  %s872_s19 = sphi %s929_s19, %s1202_s19   ;;  %s868_s18 = sphi %s927_s18, %s1201_s18  }
   0x8   : > { %p63_p0 = scmp.ne.s32.totalorder %s872_s19, %s868_s18  ;;  %p961_p1 = scmp.eq.s32.totalorder %s575_s24, 0 }
   0x9   : > { %p965_p2 = scmp.eq.s32.totalorder %s575_s24, 1  ;;  %p191_p3 = scmp.eq.s32.totalorder %s576_s25, 1 }
   0xa   : > { %s1187_s26 = scalar_select %p961_p1, 1, 0 }
   0xb   : > { %s1188_s27 = scalar_select %p965_p2, 1, 0 }
   0xc   : > { %p971_p4 = por %p961_p1, %p63_p0  ;;  %p577_p5 = scmp.ge.s32.totalorder %s888_s23, 1 }
   0xd   : > { %p976_p6 = por %p191_p3, %p63_p0  ;;  %p198_p7 = scmp.lt.s32.totalorder %s888_s23, 3 }
   0xe   : > { %s1189_s28 = scalar_select %p971_p4, 1, 0 }
   0xf   : > { %s1190_s29 = scalar_select %p976_p6, 1, 0 }
  0x10   : > { %p981_p8 = pnand %p577_p5, %p198_p7  ;;  %s890_s6 = smov [#allocation5]  }
  0x11   : > { %s213_s7 = sshll.u32 %s890_s6, 4  ;;  %s891_s8 = smov [#allocation7]   ;;  %s214_s7 = int_to_ptr.vmem [resolvable:$true] %s213_s7 }
  0x12   : > { %s1191_s30 = scalar_select %p981_p8, 1, 0 }
  0x13   : > { %p640_p10 = pneg %p981_p8  ;;  %s232_s9 = sshll.u32 %s891_s8, 4  ;;  %s994_s9 = int_to_ptr.vmem [resolvable:$true] %s232_s9 }
  0x14   : > { %s716_s13 = scalar_lea.hbm %s1178_s1, 128 }
  0x15   : > { %p990_p11 = pnand %p640_p10, %p961_p1  ;;  %p717_p12 = scmp.ne.s32.totalorder %s1178_s1, %s716_s13 }
  0x16   : > { %p723_p5 = scmp.lt.u32.totalorder %s716_s13, %s1178_s1 }
  0x17   : > { %p718_p13 = pneg %p990_p11 }
  0x19   : > { %p719_p0 = pnand %p718_p13, %p717_p12 }
  0x1b   : > { %p720_p3 = pneg %p719_p0 }
  0x1d   : > { %p725_p7 = pnand %p723_p5, %p720_p3 }
  0x1f   : > { %728 = shalt.err (!%p725_p7)
}
  0x20   : > { %s729_s24 = scalar_lea.vmem %s214_s7, 128  ;;  %p737_p1 = scmp.lt.s32.totalorder %s214_s7, %s214_s7 }
  0x21   : > { %p730_p10 = scmp.ne.s32.totalorder %s214_s7, %s729_s24  ;;  %p738_p4 = scmp.lt.s32.totalorder %s729_s24, %s729_s24 }
  0x23   : > { %p732_p9 = pnand %p730_p10, %p718_p13  ;;  %p739_p8 = por %p738_p4, %p737_p1 }
  0x25   : > { %p733_p6 = pneg %p732_p9 }
  0x27   : > { %p740_p2 = pnand %p739_p8, %p733_p6 }
  0x29   : > { %743 = shalt.err (!%p740_p2)
}
  0x2a   : > { %643 = dma.hbm_to_vmem [thread:$0]  (!%p990_p11), %s1178_s1, 128, %s214_s7, [#allocation6]  }
  0x2b   : > { %s744_s12 = scalar_lea.hbm %s1181_s4, 4096 }
  0x2c   : > { %p745_p9 = scmp.ne.s32.totalorder %s1181_s4, %s744_s12  ;;  %p751_p2 = scmp.lt.u32.totalorder %s744_s12, %s1181_s4 }
  0x2e   : > { %p747_p1 = pnand %p745_p9, %p718_p13 }
  0x30   : > { %p748_p4 = pneg %p747_p1 }
  0x32   : > { %p753_p6 = pnand %p751_p2, %p748_p4 }
  0x34   : > { %756 = shalt.err (!%p753_p6)
}
  0x35   : > { %s757_s7 = scalar_lea.vmem %s994_s9, 4096  ;;  %p765_p3 = scmp.lt.s32.totalorder %s994_s9, %s994_s9 }
  0x36   : > { %p758_p8 = scmp.ne.s32.totalorder %s994_s9, %s757_s7  ;;  %p766_p5 = scmp.lt.s32.totalorder %s757_s7, %s757_s7 }
  0x38   : > { %p760_p12 = pnand %p758_p8, %p718_p13  ;;  %p767_p7 = por %p766_p5, %p765_p3 }
  0x3a   : > { %p761_p0 = pneg %p760_p12 }
  0x3c   : > { %p768_p10 = pnand %p767_p7, %p761_p0 }
  0x3e   : > { %771 = shalt.err (!%p768_p10)
}
  0x3f   : > { %s892_s17 = smov 256   ;;  %s893_s24 = smov 16  }
  0x40   : > { %646 = dma.hbm_to_vmem [thread:$0]  (!%p990_p11), %s1181_s4, 4096, %s994_s9, [#allocation6], %s892_s17, %s892_s17, %s893_s24  }
  0x41   : > { %s41_s8 = sadd.s32 1, %s884_s22  ;;  %s50_s11 = sadd.s32 1, %s876_s20 }
  0x42   : > { %p43_p13 = scmp.ge.s32.totalorder %s41_s8, 2  ;;  %p57_p9 = scmp.ne.s32.totalorder %s876_s20, %s872_s19 }
  0x43   : > { %p58_p1 = scmp.eq.s32.totalorder %s888_s23, 0  ;;  %p657_p4 = scmp.lt.s32.totalorder %s888_s23, 2 }
  0x44   : > { %s1207_s8 = smov (%p43_p13, %s41_s8), 0  ;;  %p1193_p6 = scmp.ne.s32.totalorder %s1188_s27, 0 }
  0x45   : > { %p59_p2 = por %p58_p1, %p57_p9  ;;  %s45_s10 = ssub.s32 %s884_s22, %s1207_s8 }
  0x46   : > { %p1053_p8 = por %p1193_p6, %p57_p9  ;;  %s246_s13 = sand.u32 1, %s876_s20  }
  0x47   : > { %p48_p12 = scmp.eq.s32.totalorder %s45_s10, 0  ;;  %s581_s9 = sshll.u32 %s246_s13, 3 }
  0x48   : > { %s582_s14 = sshll.u32 %s884_s22, 7  ;;  %s250_s27 = scalar_lea.vmem [#allocation2], %s581_s9 }
  0x49   : > { %s1062_s15 = scalar_select %p48_p12, %s876_s20, %s50_s11  }
  0x4a   : > { %s1067_s17 = scalar_lea.hbm %s1177_s0, %s582_s14  ;;  %s258_s24 = sshll.u32 %s250_s27, 4  ;;  %s1075_s24 = int_to_ptr.vmem [resolvable:$true] %s258_s24 }
  0x4b   : > { %p1071_p11 = pnand %p657_p4, %p59_p2  ;;  %s247_s6 = scalar_lea.sflag [#allocation3], %s246_s13 }
  0x4c   : > { %s772_s11 = scalar_lea.hbm %s1067_s17, 128  ;;  %s777_s14 = scalar_lea.hbm %s1177_s0, 256 }
  0x4d   : > { %p773_p0 = scmp.ne.s32.totalorder %s1067_s17, %s772_s11  ;;  %p774_p3 = pneg %p1071_p11 }
  0x4e   : > { %p778_p10 = scmp.lt.u32.totalorder %s1067_s17, %s1177_s0  ;;  %p779_p13 = scmp.lt.u32.totalorder %s777_s14, %s772_s11 }
  0x4f   : > { %p775_p5 = pnand %p774_p3, %p773_p0  ;;  %p781_p1 = scmp.lt.u32.totalorder %s772_s11, %s1067_s17 }
  0x50   : > { %p780_p9 = por %p779_p13, %p778_p10 }
  0x51   : > { %p776_p7 = pneg %p775_p5 }
  0x52   : > { %p782_p4 = por %p781_p1, %p780_p9 }
  0x54   : > { %p783_p2 = pnand %p782_p4, %p776_p7 }
  0x56   : > { %786 = shalt.err (!%p783_p2)
}
  0x57   : > { %s787_s13 = scalar_lea.vmem %s1075_s24, 128  ;;  %s894_s27 = smov [#allocation2]  }
  0x58   : > { %p788_p6 = scmp.ne.s32.totalorder %s1075_s24, %s787_s13  ;;  %s792_s10 = sshll.u32 %s894_s27, 4  ;;  %s793_s10 = int_to_ptr.vmem [resolvable:$false] %s792_s10 }
  0x59   : > { %s794_s9 = scalar_lea.vmem %s793_s10, 256  ;;  %p795_p5 = scmp.lt.s32.totalorder %s1075_s24, %s793_s10 }
  0x5a   : > { %p790_p12 = pnand %p788_p6, %p774_p3  ;;  %p796_p10 = scmp.lt.s32.totalorder %s794_s9, %s787_s13 }
  0x5c   : > { %p791_p0 = pneg %p790_p12  ;;  %p797_p13 = por %p796_p10, %p795_p5 }
  0x5e   : > { %p798_p9 = pnand %p797_p13, %p791_p0 }
  0x60   : > { %801 = shalt.err (!%p798_p9)
}
  0x61   : > { %650 = dma.hbm_to_vmem [thread:$0]  (!%p1071_p11), %s1067_s17, 128, %s1075_s24, %s247_s6  }
  0x62   : > { %p1196_p7 = scmp.ne.s32.totalorder %s1191_s30, 0 }
  0x63   : > { %s1105_s11 = sand.u32 (!%p1196_p7), 1, %s872_s19   ;;  %p1197_p3 = scmp.ne.s32.totalorder (!%p1196_p7), %s1189_s28, 0 }
  0x64   : > { %267 = sbr.rel (%p1196_p7) target bundleno = 652 (0x28c), region = 40  ;;  %s584_s14 = sshll.u32 (!%p1196_p7), %s1105_s11, 3 }
  0x65   : > { %s270_s16 = scalar_lea.sflag (!%p1196_p7), [#allocation3], %s1105_s11  ;;  %s273_s7 = scalar_lea.vmem (!%p1196_p7), [#allocation2], %s584_s14 }
  0x6b   : > { %855 = dma.done.wait (%p1197_p3), %s270_s16, 128  }
  0x6c   : > { %857 = vsyncadd (%p1197_p3), %s270_s16, 4294967168  ;;  %p1198_p1 = scmp.ne.s32.totalorder %s1187_s26, 0 }
  0x6e   : > { %859 = dma.done.wait (%p1198_p1), [#allocation6], 4224  }
  0x6f   : > { %861 = vsyncadd (%p1198_p1), [#allocation6], 4294963072  ;;  %v310_v0 = vld [vmem:[%s273_s7] sm:$0xff]  ;;  %v311_v1 = vld [vmem:[#allocation5] sm:$0xff]  ;;  %v895_v44 = vmov 0.0   ;;  %s587_s24 = sshll.u32 %s1105_s11, 4 }
  0x70   : > { %v312_v2 = vadd.f32 %v311_v1, %v310_v0  ;;  %v342_v3 = vld [vmem:[#allocation7 + $0x8] sm:$0xff]  ;;  %v344_v4 = vld [vmem:[#allocation7 + $0x18] sm:$0xff]  ;;  %v341_v5 = vld [vmem:[#allocation7] sm:$0xff]  ;;  %437 = vmatprep.mubr.f32.mxu0 %v895_v44  ;;  %s307_s25 = scalar_lea.vmem [#allocation8], %s587_s24  ;;  %s595_s13 = sshll.u32 %s880_s21, 8 }
  0x71   : > { %v596_v6 = vpack.c.bf16 %v344_v4, %v342_v3  ;;  %v343_v7 = vld [vmem:[#allocation7 + $0x10] sm:$0xff]  ;;  %v346_v8 = vld [vmem:[#allocation7 + $0x28] sm:$0xff]  ;;  %v348_v9 = vld [vmem:[#allocation7 + $0x38] sm:$0xff]  ;;  %s465_s6 = sshll.u32 %s307_s25, 4  ;;  %s1130_s9 = scalar_lea.hbm %s1182_s5, %s595_s13  ;;  %s1125_s6 = int_to_ptr.vmem [resolvable:$true] %s465_s6 }
  0x72   : > { %313 = vadd.xlane.f32.xlu0 %v312_v2  ;;  %v598_v10 = vpack.c.bf16 %v343_v7, %v341_v5  ;;  %v600_v11 = vpack.c.bf16 %v348_v9, %v346_v8  ;;  %v345_v12 = vld [vmem:[#allocation7 + $0x20] sm:$0xff]  ;;  %v347_v13 = vld [vmem:[#allocation7 + $0x30] sm:$0xff]  ;;  %v350_v14 = vld [vmem:[#allocation7 + $0x48] sm:$0xff]  ;;  %s447_s14 = scalar_lea.sflag [#allocation4], %s1105_s11  ;;  %s802_s16 = scalar_lea.vmem %s1125_s6, 256 }
  0x73   : > { %597 = vmatprep.subr.bf16.mxu0 %v596_v6  ;;  %v352_v15 = vld [vmem:[#allocation7 + $0x58] sm:$0xff]  ;;  %v602_v16 = vpack.c.bf16 %v347_v13, %v345_v12  ;;  %v349_v18 = vld [vmem:[#allocation7 + $0x40] sm:$0xff]  ;;  %v351_v19 = vld [vmem:[#allocation7 + $0x50] sm:$0xff]  ;;  %p803_p11 = scmp.ne.s32.totalorder %s1125_s6, %s802_s16  ;;  %s896_s21 = smov [#allocation8]  }
  0x74   : > { %599 = vmatpush1.bf16.msra.mxu0 %v598_v10  ;;  %v604_v17 = vpack.c.bf16 %v352_v15, %v350_v14  ;;  %v606_v20 = vpack.c.bf16 %v351_v19, %v349_v18  ;;  %v354_v25 = vld [vmem:[#allocation7 + $0x68] sm:$0xff]  ;;  %v356_v26 = vld [vmem:[#allocation7 + $0x78] sm:$0xff]  ;;  %v353_v28 = vld [vmem:[#allocation7 + $0x60] sm:$0xff]  ;;  %s806_s7 = sshll.u32 %s896_s21, 4  ;;  %s807_s7 = int_to_ptr.vmem [resolvable:$false] %s806_s7 }
  0x75   : > { %601 = vmatprep.subr.bf16.mxu0 %v600_v11  ;;  %v608_v27 = vpack.c.bf16 %v356_v26, %v354_v25  ;;  %v355_v29 = vld [vmem:[#allocation7 + $0x70] sm:$0xff]  ;;  %v358_v31 = vld [vmem:[#allocation7 + $0x88] sm:$0xff]  ;;  %v360_v32 = vld [vmem:[#allocation7 + $0x98] sm:$0xff]  ;;  %p804_p4 = pnand %p803_p11, %p1053_p8  ;;  %s808_s26 = scalar_lea.vmem %s807_s7, 512 }
  0x76   : > { %v610_v30 = vpack.c.bf16 %v355_v29, %v353_v28  ;;  %v612_v33 = vpack.c.bf16 %v360_v32, %v358_v31  ;;  %v357_v34 = vld [vmem:[#allocation7 + $0x80] sm:$0xff]  ;;  %v359_v35 = vld [vmem:[#allocation7 + $0x90] sm:$0xff]  ;;  %v362_v37 = vld [vmem:[#allocation7 + $0xa8] sm:$0xff]  ;;  %p809_p6 = scmp.lt.s32.totalorder %s1125_s6, %s807_s7  ;;  %p810_p12 = scmp.lt.s32.totalorder %s808_s26, %s802_s16 }
  0x77   : > { %v614_v36 = vpack.c.bf16 %v359_v35, %v357_v34  ;;  %v364_v38 = vld [vmem:[#allocation7 + $0xb8] sm:$0xff]  ;;  %v361_v39 = vld [vmem:[#allocation7 + $0xa0] sm:$0xff]  ;;  %v363_v41 = vld [vmem:[#allocation7 + $0xb0] sm:$0xff]  ;;  %p805_p2 = pneg %p804_p4 }
  0x78   : > { %603 = vmatpush1.bf16.msra.mxu0 %v602_v16  ;;  %v616_v40 = vpack.c.bf16 %v364_v38, %v362_v37  ;;  %v366_v42 = vld [vmem:[#allocation7 + $0xc8] sm:$0xff]  ;;  %v368_v43 = vld [vmem:[#allocation7 + $0xd8] sm:$0xff]  ;;  %v618_v45 = vpack.c.bf16 %v363_v41, %v361_v39  ;;  %v365_v47 = vld [vmem:[#allocation7 + $0xc0] sm:$0xff]  ;;  %p811_p0 = por %p810_p12, %p809_p6 }
  0x79   : > { %605 = vmatprep.subr.bf16.mxu0 %v604_v17  ;;  %v620_v46 = vpack.c.bf16 %v368_v43, %v366_v42  ;;  %v367_v48 = vld [vmem:[#allocation7 + $0xd0] sm:$0xff]  ;;  %v370_v49 = vld [vmem:[#allocation7 + $0xe8] sm:$0xff]  ;;  %v372_v50 = vld [vmem:[#allocation7 + $0xf8] sm:$0xff] }
  0x7a   : > { %v622_v51 = vpack.c.bf16 %v367_v48, %v365_v47  ;;  %v624_v52 = vpack.c.bf16 %v372_v50, %v370_v49  ;;  %v369_v53 = vld [vmem:[#allocation7 + $0xe0] sm:$0xff]  ;;  %v371_v54 = vld [vmem:[#allocation7 + $0xf0] sm:$0xff]  ;;  %v588_v60 = vld [vmem:[%s1179_s2] ss:$0 sm:$0xff]  ;;  %p812_p5 = pnand %p811_p0, %p805_p2 }
  0x7b   : > { %v626_v55 = vpack.c.bf16 %v371_v54, %v369_v53  ;;  %v589_v62 = vld [vmem:[%s1180_s3] ss:$0 sm:$0xff] }
  0x7c   : > { %607 = vmatpush1.bf16.msra.mxu0 %v606_v20 }
  0x7d   : > { %609 = vmatprep.subr.bf16.mxu0 %v608_v27 }
  0x80   : > { %611 = vmatpush1.bf16.msra.mxu0 %v610_v30 }
  0x81   : > { %613 = vmatprep.subr.bf16.mxu0 %v612_v33 }
  0x84   : > { %615 = vmatpush1.bf16.msra.mxu0 %v614_v36 }
  0x85   : > { %617 = vmatprep.subr.bf16.mxu0 %v616_v40 }
  0x88   : > { %619 = vmatpush1.bf16.msra.mxu0 %v618_v45 }
  0x89   : > { %621 = vmatprep.subr.bf16.mxu0 %v620_v46 }
  0x8c   : > { %623 = vmatpush1.bf16.msra.mxu0 %v622_v51 }
  0x8d   : > { %625 = vmatprep.subr.bf16.mxu0 %v624_v52 }
  0x90   : > { %627 = vmatpush1.bf16.msra.mxu0 %v626_v55 }
  0xff   : > { %v314_v21 = vpop.xlane.xlu0 %313 }
 0x100   : > { %v316_v22 = vmul.f32 0.0078125, %v314_v21 }
 0x102   : > { %v317_v23 = vsub.f32 %v312_v2, %v316_v22 }
 0x104   : > { %v318_v24 = vmul.f32 %v317_v23, %v317_v23 }
 0x106   : > { %319 = vadd.xlane.f32.xlu0 %v318_v24 }
 0x193   : > { %v320_v56 = vpop.xlane.xlu0 %319 }
 0x194   : > { %v321_v57 = vmul.f32 0.0078125, %v320_v56 }
 0x196   : > { %v322_v58 = vadd.f32 1e-05, %v321_v57 }
 0x198   : > { %714 = vrsqrt.f32 %v322_v58 }
 0x1a2   : > { %v715_v59 = vpop.eup %714 }
 0x1a3   : > { %v324_v61 = vmul.f32 %v715_v59, %v317_v23 }
 0x1a5   : > { %v332_v63 = vmul.f32 %v588_v60, %v324_v61 }
 0x1a7   : > { %v340_v0 = vadd.f32 %v589_v62, %v332_v63 }
 0x1a9   : > { %438 = vmatmul.mubr.f32.vlgmr.msra.gmra.mrb[0].mxu0 %v340_v0 }
 0x27c   : > { %v439_v1 = vpop.f32.mrb[0].mxu0 }
 0x27d   : > { %444 = vst [vmem:[%s307_s25] sm:$0xff] %v439_v1  ;;  %v441_v2 = vpop.f32.mrb[1].mxu0 }
 0x27e   : > { %445 = vst [vmem:[%s307_s25 + $0x8] sm:$0xff] %v441_v2 }
 0x27f   : > { %815 = shalt.err (!%p812_p5)
}
 0x280   : > { %s816_s11 = scalar_lea.hbm %s1130_s9, 256  ;;  %s820_s17 = scalar_lea.hbm %s1182_s5, 512 }
 0x281   : > { %p817_p10 = scmp.ne.s32.totalorder %s1130_s9, %s816_s11  ;;  %p821_p7 = scmp.lt.u32.totalorder %s1130_s9, %s1182_s5 }
 0x282   : > { %p822_p3 = scmp.lt.u32.totalorder %s820_s17, %s816_s11  ;;  %p824_p11 = scmp.lt.u32.totalorder %s816_s11, %s1130_s9 }
 0x283   : > { %p818_p13 = pnand %p817_p10, %p1053_p8 }
 0x284   : > { %p823_p1 = por %p822_p3, %p821_p7 }
 0x285   : > { %p819_p9 = pneg %p818_p13 }
 0x286   : > { %p825_p4 = por %p824_p11, %p823_p1 }
 0x288   : > { %p826_p2 = pnand %p825_p4, %p819_p9 }
 0x28a   : > { %829 = shalt.err (!%p826_p2)
}
 0x28b   : > { %638 = dma.vmem_to_hbm [thread:$0]  (%p1053_p8), %s1125_s6, 256, %s1130_s9, %s447_s14  }
 0x28c PF: > { %s477_s13 = sand.u32 1, %s868_s18   ;;  %p1199_p6 = scmp.ne.s32.totalorder %s1190_s29, 0 }
 0x28d   : > { %p1200_p12 = scmp.ge.s32.totalorder %s888_s23, 2  ;;  %s478_s27 = scalar_lea.sflag [#allocation4], %s477_s13 }
 0x28f   : > { %p652_p0 = pnand %p1200_p12, %p1199_p6 }
 0x291   : > { %863 = dma.done.wait (!%p652_p0), %s478_s27, 256  }
 0x292   : > { %865 = vsyncadd (!%p652_p0), %s478_s27, 4294967040  ;;  %s22_s23 = sadd.s32 1, %s888_s23   ;;  %s1201_s18 = smov %s872_s19 }
 0x293   : > { %p19_p5 = scmp.ge.s32.totalorder %s22_s23, 4   ;;  %s1202_s19 = smov %s876_s20 }
 0x294   : > { %s1203_s20 = smov %s1062_s15  ;;  %s1204_s21 = smov %s884_s22 }
 0x295   : > { %s1205_s22 = smov %s1207_s8  ;;  %21 = sbr.rel (!%p19_p5) target bundleno = 7 (0x7), region = 95 }
 0x29c   :  { %483 = vsyncpa [#allocation3], 1 }
 0x29d   :  { %485 = vsyncpa [#allocation3 + $0x1], 1 }
 0x29e   :  { %486 = vsyncpa [#allocation6], 1 }
 0x29f   :  { %487 = vsyncpa [#allocation4], 1 }
 0x2a0   :  { %489 = vsyncpa [#allocation4 + $0x1], 1 }

</bundles_post_ra>
